<compile_context>
chip_gen: v5e
topology: v5e:2x2
jax: 0.10.0
libtpu: 0.0.40
codegen_flags: <defaults>
</compile_context>

<pallas_src>
import functools

import jax
import jax.numpy as jnp
from jax.experimental import pallas as pl
from jax.experimental.pallas import tpu as pltpu


def _round_up(n: int, m: int) -> int:
    return ((n + m - 1) // m) * m


def _sublayer_connection_kernel(x_ref, params_ref, w_ref, o_ref, *, eps: float):
    # x_ref:      (TM, D)  current tile of tokens (f32)
    # params_ref: (3, D)   row 0: a_2, row 1: b_2, row 2: Linear bias (f32)
    # w_ref:      (D, D)   sublayer (Linear) weight in bf16, applied as normed @ W
    x = x_ref[...].astype(jnp.float32)
    d = x.shape[-1]

    a2 = params_ref[0:1, :]
    b2 = params_ref[1:2, :]
    bias = params_ref[2:3, :]

    # ---- LayerNorm (Annotated-Transformer semantics: unbiased std, eps on std) ----
    mean = jnp.mean(x, axis=-1, keepdims=True)
    centered = x - mean
    var_unbiased = jnp.sum(centered * centered, axis=-1, keepdims=True) / (d - 1)
    std = jnp.sqrt(var_unbiased)
    inv = pl.reciprocal(std + eps, approx=True)          # EUP slot (free-ish)
    normed = a2 * (centered * inv) + b2

    # ---- sublayer: Linear(D, D) on the MXU, bf16 operands, f32 accumulate ----
    y = jnp.dot(normed.astype(jnp.bfloat16), w_ref[...],
                preferred_element_type=jnp.float32) + bias

    # ---- dropout (eval mode -> identity) + residual ----
    o_ref[...] = (x + y).astype(o_ref.dtype)


def sublayer_connection(x, a2, b2, w, bias, *, eps=1e-6, tile_rows=512):
    """x: [B, S, D] float32. Returns [B, S, D]."""
    B, S, D = x.shape
    N = B * S
    x2d = x.reshape(N, D)

    # Row tile: big (MXU/DMA efficiency) but clamped for small inputs; pad the
    # token count up to a multiple of the tile instead of asserting.
    tm = min(int(tile_rows), _round_up(N, 8))
    n_pad = _round_up(N, tm)
    if n_pad != N:
        x2d = jnp.pad(x2d, ((0, n_pad - N), (0, 0)))

    # Fuse the three tiny per-channel parameter vectors into one (3, D) block.
    params = jnp.stack(
        [a2.reshape(D), b2.reshape(D), bias.reshape(D)]).astype(jnp.float32)
    w_bf16 = w.astype(jnp.bfloat16)

    # VMEM budget: double-buffered x tile + out tile (f32), bf16 weight
    # (conservatively counted double-buffered), fused params, plus headroom.
    needed = (2 * 2 * tm * D * 4      # x in + out, 2 buffers each, f32
              + 2 * D * D * 2         # bf16 W
              + 2 * 3 * D * 4)        # fused params
    vmem_limit = int(min(max(needed + (8 << 20), 16 << 20), 64 << 20))

    kernel = functools.partial(_sublayer_connection_kernel, eps=eps)

    out2d = pl.pallas_call(
        kernel,
        out_shape=jax.ShapeDtypeStruct((n_pad, D), x.dtype),
        grid_spec=pltpu.PrefetchScalarGridSpec(
            num_scalar_prefetch=0,
            grid=(n_pad // tm,),
            in_specs=[
                pl.BlockSpec((tm, D), lambda i: (i, 0)),   # x tile
                pl.BlockSpec((3, D), lambda i: (0, 0)),    # a_2 / b_2 / bias
                pl.BlockSpec((D, D), lambda i: (0, 0)),    # W (bf16, resident)
            ],
            out_specs=pl.BlockSpec((tm, D), lambda i: (i, 0)),
        ),
        compiler_params=pltpu.CompilerParams(
            dimension_semantics=("parallel",),
            vmem_limit_bytes=vmem_limit),
    )(x2d, params, w_bf16)

    if n_pad != N:
        out2d = out2d[:N]
    return out2d.reshape(B, S, D)


def _reference(x, a2, b2, w, bias, eps=1e-6):
    # Pure-JAX reference mirroring the PyTorch module (eval-mode dropout),
    # with the matmul operands rounded to bf16 exactly like the kernel's MXU path.
    d = x.shape[-1]
    mean = jnp.mean(x, axis=-1, keepdims=True)
    centered = x - mean
    std = jnp.sqrt(jnp.sum(centered * centered, axis=-1, keepdims=True) / (d - 1))
    normed = a2 * centered / (std + eps) + b2
    y = jnp.dot(normed.astype(jnp.bfloat16).astype(jnp.float32),
                w.astype(jnp.bfloat16).astype(jnp.float32)) + bias
    return x + y


if __name__ == "__main__":
    key = jax.random.PRNGKey(0)
    B, S, D = 2, 8, 32  # batch=2, seq=8, hidden=32 (demo; real D should be /128)

    kx, kw, kb = jax.random.split(key, 3)
    x = jax.random.normal(kx, (B, S, D), dtype=jnp.float32)

    # LayerNorm params (as in __init__: ones / zeros).
    a2 = jnp.ones((D,), dtype=jnp.float32)
    b2 = jnp.zeros((D,), dtype=jnp.float32)

    # Deterministic sublayer (Linear D->D) parameters.
    w = jax.random.normal(kw, (D, D), dtype=jnp.float32) * (1.0 / jnp.sqrt(D))
    bias = jax.random.normal(kb, (D,), dtype=jnp.float32) * 0.01

    out = sublayer_connection(x, a2, b2, w, bias)
    out = jax.block_until_ready(out)

    ref = _reference(x, a2, b2, w, bias)
    assert out.shape == (B, S, D)
    # Tolerance covers bf16 MXU operands + approximate (EUP) reciprocal.
    assert jnp.allclose(out, ref, atol=2e-2, rtol=2e-2), "mismatch vs reference"

    print("KERNEL_OK")
</pallas_src>

<mosaic_0001>
module attributes {stable_mosaic.version = 11 : i64} {
  func.func @_sublayer_connection_kernel(%arg0: i32, %arg1: memref<16x32xf32, #tpu.memory_space<vmem>>, %arg2: memref<3x32xf32, #tpu.memory_space<vmem>>, %arg3: memref<32x32xbf16, #tpu.memory_space<vmem>>, %arg4: memref<16x32xf32, #tpu.memory_space<vmem>>) attributes {dimension_semantics = [#tpu.dimension_semantics<parallel>], iteration_bounds = array<i64: 1>, scalar_prefetch = 0 : i64, scratch_operands = 0 : i64, tpu.core_type = #tpu.core_type<tc>, window_params = [{transform_indices = @transform_0, window_bounds = array<i64: 16, 32>}, {pipeline_mode = #tpu.pipeline_mode<synchronous>, transform_indices = @transform_1, window_bounds = array<i64: 3, 32>}, {pipeline_mode = #tpu.pipeline_mode<synchronous>, transform_indices = @transform_2, window_bounds = array<i64: 32, 32>}, {transform_indices = @transform_3, window_bounds = array<i64: 16, 32>}]} {
    %c0 = arith.constant 0 : index
    %c0_0 = arith.constant 0 : index
    %0 = vector.load %arg1[%c0, %c0_0] : memref<16x32xf32, #tpu.memory_space<vmem>>, vector<16x32xf32>
    %c0_1 = arith.constant 0 : index
    %c0_2 = arith.constant 0 : index
    %1 = vector.load %arg2[%c0_1, %c0_2] : memref<3x32xf32, #tpu.memory_space<vmem>>, vector<1x32xf32>
    %c1 = arith.constant 1 : index
    %c0_3 = arith.constant 0 : index
    %2 = vector.load %arg2[%c1, %c0_3] : memref<3x32xf32, #tpu.memory_space<vmem>>, vector<1x32xf32>
    %c2 = arith.constant 2 : index
    %c0_4 = arith.constant 0 : index
    %3 = vector.load %arg2[%c2, %c0_4] : memref<3x32xf32, #tpu.memory_space<vmem>>, vector<1x32xf32>
    %cst = arith.constant dense<0.000000e+00> : vector<16xf32>
    %4 = vector.multi_reduction <add>, %0, %cst [1] : vector<16x32xf32> to vector<16xf32>
    %5 = vector.shape_cast %4 : vector<16xf32> to vector<16x1xf32>
    %cst_5 = arith.constant 3.200000e+01 : f32
    %6 = vector.broadcast %cst_5 : f32 to vector<16x1xf32>
    %7 = arith.divf %5, %6 : vector<16x1xf32>
    %8 = vector.broadcast %7 : vector<16x1xf32> to vector<16x32xf32>
    %9 = arith.subf %0, %8 : vector<16x32xf32>
    %10 = arith.mulf %9, %9 : vector<16x32xf32>
    %cst_6 = arith.constant dense<0.000000e+00> : vector<16xf32>
    %11 = vector.multi_reduction <add>, %10, %cst_6 [1] : vector<16x32xf32> to vector<16xf32>
    %12 = vector.shape_cast %11 : vector<16xf32> to vector<16x1xf32>
    %cst_7 = arith.constant 3.100000e+01 : f32
    %13 = vector.broadcast %cst_7 : f32 to vector<16x1xf32>
    %14 = arith.divf %12, %13 : vector<16x1xf32>
    %15 = math.sqrt %14 : vector<16x1xf32>
    %cst_8 = arith.constant 9.99999997E-7 : f32
    %16 = vector.broadcast %cst_8 : f32 to vector<16x1xf32>
    %17 = arith.addf %15, %16 : vector<16x1xf32>
    %18 = tpu.reciprocal %17 {approx = true} : vector<16x1xf32> -> vector<16x1xf32>
    %19 = vector.broadcast %18 : vector<16x1xf32> to vector<16x32xf32>
    %20 = arith.mulf %9, %19 : vector<16x32xf32>
    %21 = vector.broadcast %1 : vector<1x32xf32> to vector<16x32xf32>
    %22 = arith.mulf %21, %20 : vector<16x32xf32>
    %23 = vector.broadcast %2 : vector<1x32xf32> to vector<16x32xf32>
    %24 = arith.addf %22, %23 : vector<16x32xf32>
    %25 = arith.truncf %24 : vector<16x32xf32> to vector<16x32xbf16>
    %c0_9 = arith.constant 0 : index
    %c0_10 = arith.constant 0 : index
    %26 = vector.load %arg3[%c0_9, %c0_10] : memref<32x32xbf16, #tpu.memory_space<vmem>>, vector<32x32xbf16>
    %cst_11 = arith.constant dense<0.000000e+00> : vector<16x32xf32>
    %27 = tpu.matmul %25, %26, %cst_11 {dimension_numbers = #tpu.dot_dimension_numbers<[1], [0], [0], [1], [0, 0, 1, 1], [], []>} : vector<16x32xbf16>, vector<32x32xbf16>, vector<16x32xf32> -> vector<16x32xf32>
    %28 = vector.broadcast %3 : vector<1x32xf32> to vector<16x32xf32>
    %29 = arith.addf %27, %28 : vector<16x32xf32>
    %30 = arith.addf %0, %29 : vector<16x32xf32>
    %c0_12 = arith.constant 0 : index
    %c0_13 = arith.constant 0 : index
    %31 = vector.load %arg4[%c0_12, %c0_13] : memref<16x32xf32, #tpu.memory_space<vmem>>, vector<16x32xf32>
    tpu.vector_store %arg4[%c0_12, %c0_13], %30 {strides = array<i32>} : memref<16x32xf32, #tpu.memory_space<vmem>>, vector<16x32xf32>,
    return
  }
  func.func @transform_0(%arg0: i32) -> (i32, i32) {
    %c0_i32 = arith.constant 0 : i32
    %c0_i32_0 = arith.constant 0 : i32
    return %arg0, %c0_i32 : i32, i32
  }
  func.func @transform_1(%arg0: i32) -> (i32, i32) {
    %c0_i32 = arith.constant 0 : i32
    %c0_i32_0 = arith.constant 0 : i32
    %c0_i32_1 = arith.constant 0 : i32
    return %c0_i32, %c0_i32_0 : i32, i32
  }
  func.func @transform_2(%arg0: i32) -> (i32, i32) {
    %c0_i32 = arith.constant 0 : i32
    %c0_i32_0 = arith.constant 0 : i32
    %c0_i32_1 = arith.constant 0 : i32
    return %c0_i32, %c0_i32_0 : i32, i32
  }
  func.func @transform_3(%arg0: i32) -> (i32, i32) {
    %c0_i32 = arith.constant 0 : i32
    %c0_i32_0 = arith.constant 0 : i32
    return %arg0, %c0_i32 : i32, i32
  }
}

</mosaic_0001>

<bundles_post_ra>
// kernel: tpu_custom_call.1
= control target key start
LH: loop header
LB: loop body
LE: loop exit
PB: predicated region body
PF: predicated region fallthrough
CT: control target
= control target key end

     0   :  { %8 = vsyncpa [#allocation3], 0  ;;  %s399_s0 = inlined_call_operand.hbm [shape: f32[16,32], index: 0, kind: input, shape index: {}]   ;;  %s400_s1 = inlined_call_operand.hbm [shape: f32[3,32], index: 1, kind: input, shape index: {}]   ;;  %s401_s2 = inlined_call_operand.hbm [shape: bf16[32,32], index: 2, kind: input, shape index: {}]   ;;  %s402_s3 = inlined_call_operand.hbm [shape: f32[16,32], index: 3, kind: output, shape index: {}]  }
   0x1   :  { %9 = vsyncpa [#allocation6], 0  ;;  %s29_s14 = sshll.u32 %s400_s1, 4  ;;  %s30_s14 = int_to_ptr.hbm [resolvable:$true] %s29_s14 }
   0x2   :  { %10 = vsyncpa [#allocation4], 0  ;;  %s334_s15 = smov [#allocation5]   ;;  %s15_s19 = sshll.u32 %s399_s0, 4  ;;  %s16_s19 = int_to_ptr.hbm [resolvable:$true] %s15_s19 }
   0x3   :  { %s31_s16 = sshll.u32 %s334_s15, 4  ;;  %s335_s20 = smov [#allocation2]   ;;  %s32_s16 = int_to_ptr.vmem [resolvable:$true] %s31_s16 }
   0x4   :  { %34 = dma.hbm_to_vmem [thread:$0]  %s30_s14, 64, %s32_s16, [#allocation6]  }
   0x5   :  { %s17_s21 = sshll.u32 %s335_s20, 4  ;;  %s336_s22 = smov 128   ;;  %s18_s21 = int_to_ptr.vmem [resolvable:$true] %s17_s21 }
   0x6   :  { %s337_s23 = smov 8   ;;  %s39_s25 = sshll.u32 %s401_s2, 4  ;;  %s40_s25 = int_to_ptr.hbm [resolvable:$true] %s39_s25 }
   0x7   :  { %23 = dma.hbm_to_vmem [thread:$0]  %s16_s19, 256, %s18_s21, [#allocation3], %s336_s22, %s336_s22, %s337_s23  }
   0x8   :  { %s338_s26 = smov [#allocation7]   ;;  %s339_s0 = smov 64  }
   0x9   :  { %s41_s27 = sshll.u32 %s338_s26, 4  ;;  %s340_s28 = smov 4   ;;  %s42_s27 = int_to_ptr.vmem [resolvable:$true] %s41_s27 }
   0xa   :  { %47 = dma.hbm_to_vmem [thread:$0]  %s40_s25, 256, %s42_s27, [#allocation6], %s339_s0, %s339_s0, %s340_s28  }
   0xb   :  { %328 = dma.done.wait [#allocation3], 256  }
   0xc   :  { %329 = vsyncadd [#allocation3], 4294967040 }
   0xd   :  { %330 = dma.done.wait [#allocation6], 320  }
   0xe   :  { %331 = vsyncadd [#allocation6], 4294966976  ;;  %vm66_vm0 = vcmask 261120   ;;  %v376_v0 = vld [vmem:[#allocation2] sm:$0xff]  ;;  %v380_v2 = vld [vmem:[#allocation2 + $0x8] sm:$0xff]  ;;  %v341_v4 = vmov 32.0  }
   0xf   :  { %v67_v1 = vsel %vm66_vm0, %v376_v0, 0.0  ;;  %v70_v3 = vsel %vm66_vm0, %v380_v2, 0.0  ;;  %220 = vrcp.f32 %v341_v4  ;;  %v342_v21 = vmov 31.0   ;;  %v206_v26 = vld [vmem:[#allocation7 + $0x8] sm:$0xff]  ;;  %v205_v28 = vld [vmem:[#allocation7] sm:$0xff]  ;;  %s343_s2 = smov [#allocation8]  }
  0x10   :  { %68 = vadd.xlane.f32.xlu0 %v67_v1  ;;  %222 = vrcp.f32 %v342_v21  ;;  %164 = vmatpush.bf16.msra.mxu0 %v206_v26  ;;  %v217_v58 = vld [vmem:[#allocation5] ss:$0 sm:$0xff]  ;;  %v218_v62 = vld [vmem:[#allocation5 + $0x1] ss:$0 sm:$0xff]  ;;  %s180_s29 = sshll.u32 %s343_s2, 4  ;;  %s182_s5 = sshll.u32 %s402_s3, 4  ;;  %s181_s29 = int_to_ptr.vmem [resolvable:$true] %s180_s29  ;;  %s183_s5 = int_to_ptr.hbm [resolvable:$true] %s182_s5 }
  0x14   :  { %165 = vmatpush.bf16.msra.mxu0 %v205_v28 }
  0x15   :  { %v221_v5 = vpop.eup %220 }
  0x16   :  { %v74_v6 = vmul.f32 32.0, %v221_v5  ;;  %vm78_vm1 = vweird.f32 %v221_v5  ;;  %v223_v22 = vpop.eup %222 }
  0x17   :  { %v93_v23 = vmul.f32 31.0, %v223_v22  ;;  %vm97_vm2 = vweird.f32 %v223_v22 }
  0x18   :  { %71 = vadd.xlane.f32.xlu0 %v70_v3  ;;  %v75_v7 = vsub.f32 1.0, %v74_v6 }
  0x19   :  { %v94_v24 = vsub.f32 1.0, %v93_v23 }
  0x1a   :  { %v76_v8 = vmul.f32 %v221_v5, %v75_v7 }
  0x1b   :  { %v95_v25 = vmul.f32 %v223_v22, %v94_v24 }
  0x1c   :  { %v77_v9 = vadd.f32 %v221_v5, %v76_v8 }
  0x1d   :  { %v96_v27 = vadd.f32 %v223_v22, %v95_v25 }
  0x1e   :  { %v79_v10 = vsel %vm78_vm1, %v221_v5, %v77_v9  ;;  %v219_v5 = vld [vmem:[#allocation5 + $0x2] ss:$0 sm:$0xff] }
  0x1f   :  { %v98_v29 = vsel %vm97_vm2, %v223_v22, %v96_v27 }
  0x83   :  { %v69_v11 = vpop.xlane.xlu0 %68 }
  0x84   :  { %v80_v12 = vmul.f32 %v79_v10, %v69_v11 }
  0x86   :  { %v82_v13 = vsub.f32 %v376_v0, %v80_v12 }
  0x88   :  { %v84_v14 = vmul.f32 %v82_v13, %v82_v13 }
  0x8a   :  { %v86_v15 = vsel %vm66_vm0, %v84_v14, 0.0 }
  0x8b   :  { %87 = vadd.xlane.f32.xlu1 %v86_v15  ;;  %v72_v16 = vpop.xlane.xlu0 %71 }
  0x8c   :  { %v81_v17 = vmul.f32 %v79_v10, %v72_v16 }
  0x8e   :  { %v83_v18 = vsub.f32 %v380_v2, %v81_v17 }
  0x90   :  { %v85_v19 = vmul.f32 %v83_v18, %v83_v18 }
  0x92   :  { %v89_v20 = vsel %vm66_vm0, %v85_v19, 0.0 }
  0x93   :  { %90 = vadd.xlane.f32.xlu1 %v89_v20 }
  0xfe   :  { %v88_v30 = vpop.xlane.xlu1 %87 }
  0xff   :  { %v99_v31 = vmul.f32 %v98_v29, %v88_v30 }
 0x101   :  { %224 = vrsqrt.f32 %v99_v31  ;;  %vm108_vm3 = vcmp.eq.f32.partialorder %v99_v31, inf  ;;  %v111_v44 = vand.u32 2147483648, %v99_v31  ;;  %vm110_vm4 = vcmp.eq.f32.partialorder %v99_v31, 0.0 }
 0x106   :  { %v91_v32 = vpop.xlane.xlu1 %90 }
 0x107   :  { %v225_v33 = vpop.eup %224  ;;  %v100_v34 = vmul.f32 %v98_v29, %v91_v32 }
 0x108   :  { %v102_v35 = vmul.f32 %v225_v33, %v99_v31 }
 0x109   :  { %226 = vrsqrt.f32 %v100_v34  ;;  %vm120_vm5 = vcmp.eq.f32.partialorder %v100_v34, inf  ;;  %v123_v52 = vand.u32 2147483648, %v100_v34  ;;  %vm122_vm6 = vcmp.eq.f32.partialorder %v100_v34, 0.0 }
 0x10a   :  { %v103_v36 = vmul.f32 %v225_v33, %v102_v35 }
 0x10c   :  { %v104_v37 = vmul.f32 0.5, %v103_v36 }
 0x10e   :  { %v105_v38 = vsub.f32 1.5, %v104_v37 }
 0x10f   :  { %v227_v39 = vpop.eup %226 }
 0x110   :  { %v114_v40 = vmul.f32 %v227_v39, %v100_v34  ;;  %v106_v41 = vmul.f32 %v225_v33, %v105_v38 }
 0x112   :  { %v115_v42 = vmul.f32 %v227_v39, %v114_v40  ;;  %v107_v43 = vmul.f32 %v106_v41, %v99_v31 }
 0x114   :  { %v116_v45 = vmul.f32 0.5, %v115_v42  ;;  %v109_v46 = vsel %vm108_vm3, %v99_v31, %v107_v43 }
 0x115   :  { %v112_v47 = vsel %vm110_vm4, %v111_v44, %v109_v46 }
 0x116   :  { %v117_v48 = vsub.f32 1.5, %v116_v45  ;;  %v125_v49 = vadd.f32 1e-06, %v112_v47 }
 0x118   :  { %v118_v50 = vmul.f32 %v227_v39, %v117_v48  ;;  %228 = vrcp.f32 %v125_v49 }
 0x11a   :  { %v119_v51 = vmul.f32 %v118_v50, %v100_v34 }
 0x11c   :  { %v121_v53 = vsel %vm120_vm5, %v100_v34, %v119_v51 }
 0x11d   :  { %v124_v54 = vsel %vm122_vm6, %v123_v52, %v121_v53 }
 0x11e   :  { %v126_v55 = vadd.f32 1e-06, %v124_v54  ;;  %v229_v56 = vpop.eup %228 }
 0x11f   :  { %v129_v57 = vmul.f32 %v229_v56, %v82_v13 }
 0x120   :  { %230 = vrcp.f32 %v126_v55 }
 0x121   :  { %v132_v61 = vmul.f32 %v217_v58, %v129_v57 }
 0x123   :  { %v135_v1 = vadd.f32 %v218_v62, %v132_v61 }
 0x126   :  { %v231_v59 = vpop.eup %230 }
 0x127   :  { %v130_v60 = vmul.f32 %v231_v59, %v83_v18 }
 0x129   :  { %v133_v63 = vmul.f32 %v217_v58, %v130_v60 }
 0x12b   :  { %v136_v3 = vadd.f32 %v218_v62, %v133_v63 }
 0x12d   :  { %v137_v4 = vpack.c.bf16 %v136_v3, %v135_v1 }
 0x12f   :  { %204 = vmatmul.msk.bf16.vlgmr.msra.gmra.mxu0 %vm66_vm0, %v137_v4 }
 0x1ac   :  { %v167_v6 = vpop.f32.mrf.mxu0 }
 0x1ad   :  { %v168_v7 = vadd.f32 %v219_v5, %v167_v6 }
 0x1af   :  { %v172_v8 = vadd.f32 %v168_v7, %v376_v0 }
 0x1b1   :  { %174 = vst.msk [vmem:[#allocation8] sm:$0xff] %vm66_vm0, %v172_v8 }
 0x1b4   :  { %v169_v9 = vpop.f32.mrf.mxu0 }
 0x1b5   :  { %v170_v10 = vadd.f32 %v219_v5, %v169_v9 }
 0x1b7   :  { %v173_v11 = vadd.f32 %v170_v10, %v380_v2 }
 0x1b9   :  { %175 = vst.msk [vmem:[#allocation8 + $0x8] sm:$0xff] %vm66_vm0, %v173_v11 }
 0x1ba   :  { %188 = dma.vmem_to_hbm [thread:$0]  %s181_s29, 256, %s183_s5, [#allocation4], %s336_s22, %s336_s22, %s337_s23  }
 0x1bb   :  { %332 = dma.done.wait [#allocation4], 256  }
 0x1bc   :  { %333 = vsyncadd [#allocation4], 4294967040 }
 0x1bd   :  { %193 = vsyncpa [#allocation3], 1 }
 0x1be   :  { %194 = vsyncpa [#allocation6], 1 }
 0x1bf   :  { %195 = vsyncpa [#allocation4], 1 }

</bundles_post_ra>
